<compile_context>
chip_gen: v6e
topology: v6e:2x2x1
jax: 0.10.0
libtpu: 0.0.40
codegen_flags: <defaults>
</compile_context>

<pallas_src>
import functools

import jax
import jax.numpy as jnp
from jax import lax
from jax.experimental import pallas as pl
from jax.experimental.pallas import tpu as pltpu


def _round_up(x, m):
    return ((x + m - 1) // m) * m


def _linear_kernel(x_ref, w_ref, b_ref, o_ref, *, compute_dtype):
    # x_ref: (TM, D) f32   w_ref: (D, O) compute_dtype   b_ref: (1, O) f32
    # In-kernel cast of the activation tile (VPU, hidden under the tile DMA),
    # single MXU matmul in (K, N) weight layout, f32 accumulate, f32 bias add,
    # direct unpadded store.
    x = x_ref[...].astype(compute_dtype)
    acc = lax.dot_general(
        x, w_ref[...],
        dimension_numbers=(((1,), (0,)), ((), ())),
        preferred_element_type=jnp.float32)           # (TM, O) f32
    o_ref[...] = acc + b_ref[...]


def mclr_forward(x, weight, bias, *, block_m=2048, compute_dtype=jnp.bfloat16):
    """Forward of Mclr_CrossEntropy: flatten(x, 1) @ weight.T + bias.

    x: (B, ...) float; weight: (O, D); bias: (O,).  Returns (B, O) f32 logits.

    compute_dtype: dtype the MXU contraction runs in (default bf16; pass
    jnp.float32 for bit-faithful nn.Linear semantics — the kernel is HBM-bound
    either way, so the extra MXU passes are free).
    """
    B = x.shape[0]
    x2d = x.reshape(B, -1)                            # torch.flatten(x, 1); stays f32
    D = x2d.shape[1]
    O = weight.shape[0]

    # Batch tile: sublane-aligned, capped at block_m.  No batch padding copy —
    # a trailing partial tile is masked by Pallas.
    # (On v7x, prefer a block_m that yields >=2 grid steps so both TCs are used.)
    TM = min(block_m, _round_up(B, 8))
    grid = (pl.cdiv(B, TM),)

    # One-time wrapper-side prep of the tiny resident operands.
    w_t = jnp.transpose(weight).astype(compute_dtype)        # (D, O), canonical (K, N)
    b2d = bias.astype(jnp.float32).reshape(1, O)              # (1, O)

    # Accurate VMEM request: double-buffered x/out tiles + single resident
    # weight/bias (lane-padded sizes) + margin.
    x_item = jnp.dtype(x2d.dtype).itemsize
    w_item = jnp.dtype(compute_dtype).itemsize
    lane_D = _round_up(D, 128)
    lane_O = _round_up(O, 128)
    vmem_bytes = int(2 * TM * lane_D * x_item        # x tiles (double-buffered)
                     + 2 * TM * lane_O * 4           # out tiles (double-buffered, f32)
                     + D * lane_O * w_item           # resident weight
                     + lane_O * 4                    # resident bias
                     + (2 << 20))                    # margin

    cost = pl.CostEstimate(
        flops=2 * B * D * O,
        transcendentals=0,
        bytes_accessed=(B * D * x_item + D * O * w_item + O * 4 + B * O * 4))

    out = pl.pallas_call(
        functools.partial(_linear_kernel, compute_dtype=compute_dtype),
        out_shape=jax.ShapeDtypeStruct((B, O), jnp.float32),
        grid_spec=pltpu.PrefetchScalarGridSpec(
            num_scalar_prefetch=0,
            grid=grid,
            in_specs=[
                pl.BlockSpec((TM, D), lambda i: (i, 0)),   # x: pipelined f32 tiles
                pl.BlockSpec((D, O), lambda i: (0, 0)),    # weight: VMEM-resident
                pl.BlockSpec((1, O), lambda i: (0, 0)),    # bias: VMEM-resident
            ],
            out_specs=pl.BlockSpec((TM, O), lambda i: (i, 0)),  # unpadded logits
        ),
        compiler_params=pltpu.CompilerParams(
            dimension_semantics=("parallel",),   # batch tiles are independent
            vmem_limit_bytes=vmem_bytes),
        cost_estimate=cost,
    )(x2d, w_t, b2d)

    return out


if __name__ == "__main__":
    input_dim, output_dim = 784, 10
    batch = 8

    key = jax.random.PRNGKey(0)
    k_x, k_w, k_b = jax.random.split(key, 3)

    # PyTorch-style uniform(-1/sqrt(D), 1/sqrt(D)) init.
    bound = 1.0 / jnp.sqrt(jnp.float32(input_dim))
    weight = jax.random.uniform(k_w, (output_dim, input_dim), jnp.float32,
                                minval=-bound, maxval=bound)
    bias = jax.random.uniform(k_b, (output_dim,), jnp.float32,
                              minval=-bound, maxval=bound)

    # MNIST-shaped input (B, 1, 28, 28) -> flattened to 784.
    x = jax.random.normal(k_x, (batch, 1, 28, 28), jnp.float32)

    out = mclr_forward(x, weight, bias)
    out = jax.block_until_ready(out)
    assert out.shape == (batch, output_dim)
    assert out.dtype == jnp.float32

    x2d = x.reshape(batch, -1)

    # Reference 1: matches the kernel math exactly (bf16 operands, f32 accumulate).
    xb = x2d.astype(jnp.bfloat16).astype(jnp.float32)
    wb = weight.astype(jnp.bfloat16).astype(jnp.float32)
    ref_bf16 = jnp.dot(xb, wb.T, precision=lax.Precision.HIGHEST) + bias
    assert jnp.allclose(out, ref_bf16, atol=2e-3, rtol=2e-3)

    # Reference 2: full-f32 module semantics (loose tolerance due to bf16 compute).
    ref_f32 = jnp.dot(x2d, weight.T, precision=lax.Precision.HIGHEST) + bias
    assert jnp.allclose(out, ref_f32, atol=5e-2, rtol=5e-2)

    print("KERNEL_OK")
</pallas_src>

<mosaic_0001>
module attributes {stable_mosaic.version = 11 : i64} {
  func.func @_linear_kernel(%arg0: i32, %arg1: memref<8x784xf32, #tpu.memory_space<vmem>>, %arg2: memref<784x10xbf16, #tpu.memory_space<vmem>>, %arg3: memref<1x10xf32, #tpu.memory_space<vmem>>, %arg4: memref<8x10xf32, #tpu.memory_space<vmem>>) attributes {dimension_semantics = [#tpu.dimension_semantics<parallel>], iteration_bounds = array<i64: 1>, scalar_prefetch = 0 : i64, scratch_operands = 0 : i64, tpu.core_type = #tpu.core_type<tc>, window_params = [{transform_indices = @transform_0, window_bounds = array<i64: 8, 784>}, {pipeline_mode = #tpu.pipeline_mode<synchronous>, transform_indices = @transform_1, window_bounds = array<i64: 784, 10>}, {pipeline_mode = #tpu.pipeline_mode<synchronous>, transform_indices = @transform_2, window_bounds = array<i64: 1, 10>}, {transform_indices = @transform_3, window_bounds = array<i64: 8, 10>}]} {
    %c0 = arith.constant 0 : index
    %c0_0 = arith.constant 0 : index
    %0 = vector.load %arg1[%c0, %c0_0] : memref<8x784xf32, #tpu.memory_space<vmem>>, vector<8x784xf32>
    %1 = arith.truncf %0 : vector<8x784xf32> to vector<8x784xbf16>
    %c0_1 = arith.constant 0 : index
    %c0_2 = arith.constant 0 : index
    %2 = vector.load %arg2[%c0_1, %c0_2] : memref<784x10xbf16, #tpu.memory_space<vmem>>, vector<784x10xbf16>
    %cst = arith.constant dense<0.000000e+00> : vector<8x10xf32>
    %3 = tpu.matmul %1, %2, %cst {dimension_numbers = #tpu.dot_dimension_numbers<[1], [0], [0], [1], [0, 0, 1, 1], [], []>} : vector<8x784xbf16>, vector<784x10xbf16>, vector<8x10xf32> -> vector<8x10xf32>
    %c0_3 = arith.constant 0 : index
    %c0_4 = arith.constant 0 : index
    %4 = vector.load %arg3[%c0_3, %c0_4] : memref<1x10xf32, #tpu.memory_space<vmem>>, vector<1x10xf32>
    %5 = vector.broadcast %4 : vector<1x10xf32> to vector<8x10xf32>
    %6 = arith.addf %3, %5 : vector<8x10xf32>
    %c0_5 = arith.constant 0 : index
    %c0_6 = arith.constant 0 : index
    %7 = vector.load %arg4[%c0_5, %c0_6] : memref<8x10xf32, #tpu.memory_space<vmem>>, vector<8x10xf32>
    tpu.vector_store %arg4[%c0_5, %c0_6], %6 {strides = array<i32>} : memref<8x10xf32, #tpu.memory_space<vmem>>, vector<8x10xf32>,
    return
  }
  func.func @transform_0(%arg0: i32) -> (i32, i32) {
    %c0_i32 = arith.constant 0 : i32
    %c0_i32_0 = arith.constant 0 : i32
    return %arg0, %c0_i32 : i32, i32
  }
  func.func @transform_1(%arg0: i32) -> (i32, i32) {
    %c0_i32 = arith.constant 0 : i32
    %c0_i32_0 = arith.constant 0 : i32
    %c0_i32_1 = arith.constant 0 : i32
    return %c0_i32, %c0_i32_0 : i32, i32
  }
  func.func @transform_2(%arg0: i32) -> (i32, i32) {
    %c0_i32 = arith.constant 0 : i32
    %c0_i32_0 = arith.constant 0 : i32
    %c0_i32_1 = arith.constant 0 : i32
    return %c0_i32, %c0_i32_0 : i32, i32
  }
  func.func @transform_3(%arg0: i32) -> (i32, i32) {
    %c0_i32 = arith.constant 0 : i32
    %c0_i32_0 = arith.constant 0 : i32
    return %arg0, %c0_i32 : i32, i32
  }
}

</mosaic_0001>

<bundles_post_ra>
// kernel: tpu_custom_call.1
= control target key start
LH: loop header
LB: loop body
LE: loop exit
PB: predicated region body
PF: predicated region fallthrough
CT: control target
= control target key end

     0   :  { %v808_v44 = vmov 0.0   ;;  %vm809_vm0 = vmmov 0   ;;  %vm429_vm1 = vcmask 130048   ;;  %s1005_s0 = inlined_call_operand.vmem [shape: f32[8,784], index: 0, kind: input, shape index: {}]   ;;  %s1006_s1 = inlined_call_operand.vmem [shape: bf16[784,10], index: 1, kind: input, shape index: {}]   ;;  %s1007_s2 = inlined_call_operand.vmem [shape: f32[1,10], index: 2, kind: input, shape index: {}]   ;;  %s1008_s3 = inlined_call_operand.hbm [shape: f32[8,10], index: 3, kind: output, shape index: {}]  }
   0x1   :  { %v737_v0 = vld [vmem:[%s1006_s1 + $0x78] sm:$0xff]   ;;  %v741_v4 = vld [vmem:[%s1006_s1 + $0x70] sm:$0xff]   ;;  %v745_v8 = vld [vmem:[%s1006_s1 + $0x68] sm:$0xff]  }
   0x2   :  { %v738_v1 = vld [vmem:[%s1006_s1 + $0x38] sm:$0xff]   ;;  %660 = vmatprep.subr.bf16.mxu0 %v737_v0  ;;  %v742_v5 = vld [vmem:[%s1006_s1 + $0x30] sm:$0xff]   ;;  %v746_v9 = vld [vmem:[%s1006_s1 + $0x28] sm:$0xff]  }
   0x3   :  { %v739_v2 = vld [vmem:[%s1006_s1 + $0xf8] sm:$0xff]   ;;  %661 = vmatpush3.bf16.msra.mxu0 %v738_v1  ;;  %v743_v6 = vld [vmem:[%s1006_s1 + $0xf0] sm:$0xff]   ;;  %v747_v10 = vld [vmem:[%s1006_s1 + $0xe8] sm:$0xff]  }
   0x4   :  { %v740_v3 = vld [vmem:[%s1006_s1 + $0xb8] sm:$0xff]   ;;  %682 = vmatprep.subr.bf16.mxu1 %v739_v2  ;;  %662 = vmatprep.subr.bf16.mxu0 %v741_v4  ;;  %v744_v7 = vld [vmem:[%s1006_s1 + $0xb0] sm:$0xff]   ;;  %v748_v11 = vld [vmem:[%s1006_s1 + $0xa8] sm:$0xff]  }
   0x5   :  { %683 = vmatpush3.bf16.msra.mxu1 %v740_v3  ;;  %v749_v12 = vld [vmem:[%s1006_s1 + $0x60] sm:$0xff]   ;;  %v753_v16 = vld [vmem:[%s1006_s1 + $0x58] sm:$0xff]   ;;  %v757_v20 = vld [vmem:[%s1006_s1 + $0x50] sm:$0xff]  }
   0x6   :  { %684 = vmatprep.subr.bf16.mxu1 %v743_v6  ;;  %v750_v13 = vld [vmem:[%s1006_s1 + $0x20] sm:$0xff]   ;;  %v754_v17 = vld [vmem:[%s1006_s1 + $0x18] sm:$0xff]   ;;  %v758_v21 = vld [vmem:[%s1006_s1 + $0x10] sm:$0xff]  }
   0x7   :  { %663 = vmatpush3.bf16.msra.mxu0 %v742_v5  ;;  %v751_v14 = vld [vmem:[%s1006_s1 + $0xe0] sm:$0xff]   ;;  %v755_v18 = vld [vmem:[%s1006_s1 + $0xd8] sm:$0xff]   ;;  %v759_v22 = vld [vmem:[%s1006_s1 + $0xd0] sm:$0xff]  }
   0x8   :  { %664 = vmatprep.subr.bf16.mxu0 %v745_v8  ;;  %v752_v15 = vld [vmem:[%s1006_s1 + $0xa0] sm:$0xff]   ;;  %v756_v19 = vld [vmem:[%s1006_s1 + $0x98] sm:$0xff]   ;;  %v760_v23 = vld [vmem:[%s1006_s1 + $0x90] sm:$0xff]  }
   0x9   :  { %685 = vmatpush3.bf16.msra.mxu1 %v744_v7  ;;  %v761_v24 = vld [vmem:[%s1006_s1 + $0x48] sm:$0xff]   ;;  %v765_v28 = vld [vmem:[%s1006_s1 + $0x40] sm:$0xff]   ;;  %v769_v36 = vld [vmem:[%s1006_s1 + $0x178] sm:$0xff]  }
   0xa   :  { %686 = vmatprep.subr.bf16.mxu1 %v747_v10  ;;  %v762_v25 = vld [vmem:[%s1006_s1 + $0x8] sm:$0xff]   ;;  %v766_v29 = vld [vmem:[%s1006_s1] sm:$0xff]   ;;  %v19_v37 = vld [vmem:[%s1005_s0 + $0x18] sm:$0xff] }
   0xb   :  { %665 = vmatpush3.bf16.msra.mxu0 %v746_v9  ;;  %v763_v26 = vld [vmem:[%s1006_s1 + $0xc8] sm:$0xff]   ;;  %v767_v30 = vld [vmem:[%s1006_s1 + $0xc0] sm:$0xff]   ;;  %v26_v38 = vpack.c.bf16 %v19_v37, %v19_v37  ;;  %v770_v39 = vld [vmem:[%s1006_s1 + $0x138] sm:$0xff]  }
   0xc   :  { %666 = vmatprep.subr.bf16.mxu0 %v749_v12  ;;  %v764_v27 = vld [vmem:[%s1006_s1 + $0x88] sm:$0xff]   ;;  %v768_v33 = vld [vmem:[%s1006_s1 + $0x80] sm:$0xff]   ;;  %v18_v40 = vld [vmem:[%s1005_s0 + $0x10] sm:$0xff] }
   0xd   :  { %687 = vmatpush3.bf16.msra.mxu1 %v748_v11  ;;  %v17_v31 = vld [vmem:[%s1005_s0 + $0x8] sm:$0xff]  ;;  %v16_v34 = vld [vmem:[%s1005_s0] sm:$0xff]  ;;  %505 = vmatprep.mubr.bf16.mxu1 %v26_v38  ;;  %v25_v41 = vpack.c.bf16 %v18_v40, %v18_v40  ;;  %v771_v42 = vld [vmem:[%s1006_s1 + $0x170] sm:$0xff]  }
   0xe   :  { %688 = vmatprep.subr.bf16.mxu1 %v751_v14  ;;  %v24_v32 = vpack.c.bf16 %v17_v31, %v17_v31  ;;  %v23_v35 = vpack.c.bf16 %v16_v34, %v16_v34  ;;  %v772_v43 = vld [vmem:[%s1006_s1 + $0x130] sm:$0xff]   ;;  %v773_v45 = vld [vmem:[%s1006_s1 + $0x168] sm:$0xff]   ;;  %v775_v47 = vld [vmem:[%s1006_s1 + $0x160] sm:$0xff]  }
   0xf   :  { %667 = vmatpush3.bf16.msra.mxu0 %v750_v13  ;;  %v774_v46 = vld [vmem:[%s1006_s1 + $0x128] sm:$0xff]   ;;  %v776_v48 = vld [vmem:[%s1006_s1 + $0x120] sm:$0xff]   ;;  %v777_v49 = vld [vmem:[%s1006_s1 + $0x158] sm:$0xff]  }
  0x10   :  { %668 = vmatprep.subr.bf16.mxu0 %v753_v16  ;;  %465 = vmatprep.mubr.bf16.mxu0 %v24_v32  ;;  %v778_v50 = vld [vmem:[%s1006_s1 + $0x118] sm:$0xff]   ;;  %v783_v51 = vld [vmem:[%s1006_s1 + $0x180] sm:$0xff]   ;;  %v779_v52 = vld [vmem:[%s1006_s1 + $0x150] sm:$0xff]  }
  0x11   :  { %689 = vmatpush3.bf16.msra.mxu1 %v752_v15  ;;  %v22_v53 = vld [vmem:[%s1005_s0 + $0x30] sm:$0xff]  ;;  %v21_v54 = vld [vmem:[%s1005_s0 + $0x28] sm:$0xff] }
  0x12   :  { %690 = vmatprep.subr.bf16.mxu1 %v755_v18  ;;  %v29_v55 = vpack.c.bf16 %v22_v53, %v22_v53  ;;  %v28_v56 = vpack.c.bf16 %v21_v54, %v21_v54 }
  0x13   :  { %669 = vmatpush3.bf16.msra.mxu0 %v754_v17 }
  0x14   :  { %670 = vmatprep.subr.bf16.mxu0 %v757_v20 }
  0x15   :  { %691 = vmatpush3.bf16.msra.mxu1 %v756_v19 }
  0x16   :  { %692 = vmatprep.subr.bf16.mxu1 %v759_v22 }
  0x17   :  { %671 = vmatpush3.bf16.msra.mxu0 %v758_v21 }
  0x18   :  { %672 = vmatprep.subr.bf16.mxu0 %v761_v24 }
  0x19   :  { %693 = vmatpush3.bf16.msra.mxu1 %v760_v23 }
  0x1a   :  { %694 = vmatprep.subr.bf16.mxu1 %v763_v26 }
  0x1b   :  { %673 = vmatpush3.bf16.msra.mxu0 %v762_v25 }
  0x1c   :  { %674 = vmatprep.subr.bf16.mxu0 %v765_v28 }
  0x1d   :  { %695 = vmatpush3.bf16.msra.mxu1 %v764_v27 }
  0x1e   :  { %696 = vmatprep.subr.bf16.mxu1 %v767_v30 }
  0x1f   :  { %675 = vmatpush3.bf16.msra.mxu0 %v766_v29 }
  0x20   :  { %704 = vmatprep.subr.bf16.mxu0 %v769_v36 }
  0x21   :  { %697 = vmatpush3.bf16.msra.mxu1 %v768_v33 }
  0x22   :  { %466 = vmatmul.mubr.bf16.vlgmr.msra.gmra.mxu0 %v23_v35  ;;  %728 = vmatprep.subr.bf16.mxu1 %v808_v44 }
  0x23   :  { %705 = vmatpush3.bf16.msra.mxu0 %v770_v39 }
  0x24   :  { %506 = vmatmul.mubr.bf16.vlgmr.msra.gmra.mxu1 %v25_v41  ;;  %706 = vmatprep.subr.bf16.mxu0 %v771_v42 }
  0x25   :  { %730 = vmatprep.mubr.msk.bf16.mxu1 %vm809_vm0, %v808_v44  ;;  %729 = vmatpush3.bf16.msra.mxu1 %v783_v51 }
  0x27   :  { %707 = vmatpush3.bf16.msra.mxu0 %v772_v43 }
  0x28   :  { %708 = vmatprep.subr.bf16.mxu0 %v773_v45 }
  0x2b   :  { %709 = vmatpush3.bf16.msra.mxu0 %v774_v46 }
  0x2c   :  { %710 = vmatprep.subr.bf16.mxu0 %v775_v47 }
  0x2f   :  { %711 = vmatpush3.bf16.msra.mxu0 %v776_v48 }
  0x30   :  { %712 = vmatprep.subr.bf16.mxu0 %v777_v49 }
  0x31   :  { %8 = vsyncpa [#allocation3], 0  ;;  %v780_v57 = vld [vmem:[%s1006_s1 + $0x110] sm:$0xff]   ;;  %v781_v58 = vld [vmem:[%s1006_s1 + $0x148] sm:$0xff]   ;;  %731 = vmatmul.mubr.msk.bf16.vlgmr.msra.gmra.mxu1 %vm429_vm1, %v29_v55  ;;  %545 = vmatprep.mubr.bf16.mxu0 %v28_v56  ;;  %vm593_vm2 = vcmask 80896  }
  0x32   :  { %v782_v59 = vld [vmem:[%s1006_s1 + $0x108] sm:$0xff]   ;;  %v784_v60 = vld [vmem:[%s1006_s1 + $0x140] sm:$0xff]  }
  0x33   :  { %713 = vmatpush3.bf16.msra.mxu0 %v778_v50  ;;  %v785_v61 = vld [vmem:[%s1006_s1 + $0x100] sm:$0xff]  }
  0x34   :  { %714 = vmatprep.subr.bf16.mxu0 %v779_v52  ;;  %v20_v62 = vld [vmem:[%s1005_s0 + $0x20] sm:$0xff]  ;;  %s810_s0 = smov [#allocation2]  }
  0x35   :  { %v27_v63 = vpack.c.bf16 %v20_v62, %v20_v62  ;;  %v609_v13 = vld [vmem:[%s1007_s2] ss:$0 sm:$0xff]  ;;  %s601_s17 = sshll.u32 %s810_s0, 4  ;;  %s602_s17 = int_to_ptr.vmem [resolvable:$true] %s601_s17 }
  0x36   :  { %s786_s18 = scalar_lea.vmem %s602_s17, 128  ;;  %p791_p1 = scmp.lt.s32.totalorder %s602_s17, %s602_s17 }
  0x37   :  { %715 = vmatpush3.bf16.msra.mxu0 %v780_v57  ;;  %p787_p0 = scmp.ne.s32.totalorder %s602_s17, %s786_s18  ;;  %p792_p2 = scmp.lt.s32.totalorder %s786_s18, %s786_s18 }
  0x38   :  { %716 = vmatprep.subr.bf16.mxu0 %v781_v58 }
  0x39   :  { %p793_p3 = por %p792_p2, %p791_p1 }
  0x3b   :  { %717 = vmatpush3.bf16.msra.mxu0 %v782_v59  ;;  %p794_p4 = pnand %p793_p3, %p787_p0 }
  0x3c   :  { %718 = vmatprep.subr.bf16.mxu0 %v784_v60 }
  0x3f   :  { %719 = vmatpush3.bf16.msra.mxu0 %v785_v61 }
  0x42   :  { %546 = vmatmul.mubr.bf16.vlgmr.msra.gmra.mxu0 %v27_v63 }
  0xe2   :  { %v676_v0 = vpop.f32.mrf.mxu0 }
  0xe4   :  { %v677_v1 = vpop.f32.mrf.mxu0  ;;  %v698_v2 = vpop.f32.mrf.mxu1 }
  0xe5   :  { %v678_v12 = vadd.f32 %v677_v1, %v676_v0 }
  0xe6   :  { %v679_v3 = vpop.f32.mrf.mxu0  ;;  %v699_v4 = vpop.f32.mrf.mxu1 }
  0xe7   :  { %v468_v14 = vadd.f32 %v678_v12, %v609_v13  ;;  %v700_v15 = vadd.f32 %v699_v4, %v698_v2 }
  0xe8   :  { %v680_v5 = vpop.f32.mrf.mxu0  ;;  %v701_v6 = vpop.f32.mrf.mxu1 }
  0xe9   :  { %v508_v18 = vadd.f32 %v700_v15, %v468_v14 }
  0xea   :  { %v702_v7 = vpop.f32.mrf.mxu1 }
  0xf1   :  { %v587_v8 = vpop.f32.mrf.mxu1 }
  0xf3   :  { %v732_v9 = vpop.f32.mrf.mxu1 }
  0xf5   :  { %v590_v10 = vpop.f32.mrf.mxu1 }
  0xf7   :  { %v733_v11 = vpop.f32.mrf.mxu1 }
 0x102   :  { %v720_v16 = vpop.f32.mrf.mxu0 }
 0x104   :  { %v721_v17 = vpop.f32.mrf.mxu0 }
 0x105   :  { %v722_v19 = vadd.f32 %v721_v17, %v720_v16 }
 0x106   :  { %v723_v20 = vpop.f32.mrf.mxu0 }
 0x107   :  { %v548_v21 = vadd.f32 %v722_v19, %v508_v18 }
 0x108   :  { %v724_v22 = vpop.f32.mrf.mxu0 }
 0x109   :  { %v588_v23 = vadd.f32 %v587_v8, %v548_v21 }
 0x10b   :  { %594 = vst.msk [vmem:[#allocation2] sm:$0xff] %vm593_vm2, %v588_v23 }
 0x10c   :  { %797 = shalt.err (!%p794_p4)
}
 0x10d   :  { %604 = dma.vmem_to_hbm [thread:$0]  %s602_s17, 128, %s1008_s3, [#allocation3]  }
 0x10e   :  { %806 = dma.done.wait [#allocation3], 128  }
 0x10f   :  { %807 = vsyncadd [#allocation3], 4294967168 }
 0x110   :  { %608 = vsyncpa [#allocation3], 1 }

</bundles_post_ra>
